<compile_context>
chip_gen: v7x
topology: tpu7x:2x2x1
jax: 0.10.0
libtpu: 0.0.40
codegen_flags: <defaults>
</compile_context>

<pallas_src>
from functools import partial

import jax
import jax.numpy as jnp
from jax.experimental import pallas as pl
from jax.experimental.pallas import tpu as pltpu


def _round_up(a, b):
    return (a + b - 1) // b * b


# ---------------------------------------------------------------------------
# Kernel 1: conv-as-matmul, channel-major output (C_r, TS), bf16 MXU operands,
#           f32 accumulate over a K grid axis, per-tile partial BN stats.
# ---------------------------------------------------------------------------
def conv_stats_kernel(p_ref, w_ref, y_ref, stats_ref, acc_ref):
    # p_ref: (1, TK, TS) bf16   w_ref: (C_r, TK) bf16   acc_ref: (C_r, TS) f32
    k = pl.program_id(2)

    @pl.when(k == 0)
    def _():
        acc_ref[...] = jnp.zeros_like(acc_ref)

    acc_ref[...] += jnp.dot(w_ref[...], p_ref[0],
                            preferred_element_type=jnp.float32)   # (C_r, TS)

    @pl.when(k == pl.num_programs(2) - 1)
    def _():
        acc = acc_ref[...]                                        # f32
        y_ref[...] = acc[None].astype(y_ref.dtype)                # bf16 y -> HBM
        # Partial (sum, sum_sq) over this tile's TS pixels; zero-padded pixels /
        # channels contribute exactly 0, so no masking is needed.
        s1 = jnp.sum(acc, axis=1, keepdims=True)                  # (C_r, 1)
        s2 = jnp.sum(acc * acc, axis=1, keepdims=True)            # (C_r, 1)
        stats_ref[...] = jnp.concatenate([s1, s2], axis=1)[None, None]


# ---------------------------------------------------------------------------
# Kernel 2: fused BatchNorm affine + activation (channel-major, no transpose)
# ---------------------------------------------------------------------------
def bn_act_kernel(y_ref, scale_ref, shift_ref, o_ref, *, leaky_slope):
    # y_ref: (1, C_r, TS) bf16 ; scale/shift: (C_r, 1) f32 broadcast over lanes
    z = y_ref[0].astype(jnp.float32) * scale_ref[...] + shift_ref[...]
    if leaky_slope == 0.0:
        z = jnp.maximum(z, 0.0)
    else:
        z = jnp.where(z >= 0.0, z, leaky_slope * z)
    o_ref[...] = z[None].astype(o_ref.dtype)


# ---------------------------------------------------------------------------
# Wrapper: Block.forward (encode=True)
# ---------------------------------------------------------------------------
def block_forward(x, weight, gamma, beta, *, act="relu", eps=1e-5,
                  out_dtype=jnp.float32):
    """x: (N, C_in, H, W) NCHW; weight: (C_out, C_in, 4, 4); bias=False."""
    N, C_in, H, W = x.shape
    C_out = weight.shape[0]
    Ho, Wo = H // 2, W // 2
    S = Ho * Wo                       # output pixels per image
    K = C_in * 16                     # im2col contraction size

    # ---- tiling -------------------------------------------------------------
    C_r = _round_up(C_out, 8)         # sublane-aligned channel count (no 128 pad)
    Sr = _round_up(S, 128)
    n_s = pl.cdiv(Sr, 512)
    TS = _round_up(pl.cdiv(Sr, n_s), 128)     # spatial tile (lane dim)
    S_pad = n_s * TS
    K128 = _round_up(K, 128)

    # K-contraction tile: keep full K resident when it fits the explicit VMEM
    # budget (weight then fetched once, no accumulator re-read); otherwise tile K.
    vmem_budget = 40 * 1024 * 1024

    def working_set(tk):
        return (2 * TS * tk * 2           # patch tile, double-buffered, bf16
                + 2 * C_r * tk * 2        # weight tile, double-buffered, bf16
                + C_r * TS * 4            # f32 accumulator scratch
                + 2 * C_r * TS * 2        # bf16 y output tile, double-buffered
                + 2 * C_r * 2 * 4         # stats tile
                + (1 << 20))              # slack

    TK = K128
    while working_set(TK) > vmem_budget and TK > 512:
        TK = max(512, _round_up(TK // 2, 128))
    n_k = pl.cdiv(K128, TK)
    K_pad = n_k * TK

    # ---- prologue: reflect pad + im2col in bf16, laid out K-major (N, K, S) ---
    # TODO(synk): eliminate the materialized im2col (~4x the input bytes) by
    # assembling patches in-kernel from a 2x2 phase-decomposed padded input
    # (manual DMA / tap-decomposed matmuls); kept as an XLA prologue for now.
    xb = x.astype(jnp.bfloat16)
    xp = jnp.pad(xb, ((0, 0), (0, 0), (1, 1), (1, 1)), mode="reflect")
    cols = [xp[:, :, kh:kh + 2 * Ho:2, kw:kw + 2 * Wo:2]
            for kh in range(4) for kw in range(4)]        # each (N, C_in, Ho, Wo)
    patches = jnp.stack(cols, axis=2)                     # (N, C_in, 16, Ho, Wo)
    patches = patches.reshape(N, K, S)                    # K ordered (ci, kh, kw)
    patches = jnp.pad(patches, ((0, 0), (0, K_pad - K), (0, S_pad - S)))

    w2d = weight.reshape(C_out, K).astype(jnp.bfloat16)   # (C_out, K)
    w2d = jnp.pad(w2d, ((0, C_r - C_out), (0, K_pad - K)))

    # ---- kernel 1: conv + partial stats --------------------------------------
    # Note: when n_k == 1 the weight index_map is constant, so the pipeline does
    # not re-fetch it across grid steps (single resident copy in practice).
    y, stats = pl.pallas_call(
        conv_stats_kernel,
        out_shape=(jax.ShapeDtypeStruct((N, C_r, S_pad), jnp.bfloat16),
                   jax.ShapeDtypeStruct((N, n_s, C_r, 2), jnp.float32)),
        grid_spec=pltpu.PrefetchScalarGridSpec(
            num_scalar_prefetch=0,
            grid=(N, n_s, n_k),
            in_specs=[pl.BlockSpec((1, TK, TS), lambda n, s, k: (n, k, s)),
                      pl.BlockSpec((C_r, TK), lambda n, s, k: (0, k))],
            out_specs=(pl.BlockSpec((1, C_r, TS), lambda n, s, k: (n, 0, s)),
                       pl.BlockSpec((1, 1, C_r, 2), lambda n, s, k: (n, s, 0, 0))),
            scratch_shapes=[pltpu.VMEM((C_r, TS), jnp.float32)]),
        compiler_params=pltpu.CompilerParams(
            dimension_semantics=("parallel", "parallel", "arbitrary"),
            vmem_limit_bytes=48 * 1024 * 1024),
    )(patches, w2d)

    # ---- BatchNorm2d training-mode stats: reduce per-tile partials in f32 ----
    count = float(N * S)                                  # padded pixels added 0
    ch_sum = jnp.sum(stats[..., 0], axis=(0, 1))          # (C_r,)
    ch_ssq = jnp.sum(stats[..., 1], axis=(0, 1))
    mean = ch_sum / count
    var = jnp.maximum(ch_ssq / count - mean * mean, 0.0)  # guard cancellation
    inv_std = jax.lax.rsqrt(var + eps)
    gamma_p = jnp.pad(gamma.astype(jnp.float32), (0, C_r - C_out))
    beta_p = jnp.pad(beta.astype(jnp.float32), (0, C_r - C_out))
    scale = (gamma_p * inv_std)[:, None]                  # (C_r, 1)
    shift = (beta_p - mean * gamma_p * inv_std)[:, None]  # (C_r, 1)

    # ---- kernel 2: fused BN affine + activation ------------------------------
    slope = 0.0 if act == "relu" else 0.2
    out = pl.pallas_call(
        partial(bn_act_kernel, leaky_slope=slope),
        out_shape=jax.ShapeDtypeStruct((N, C_r, S_pad), out_dtype),
        grid_spec=pltpu.PrefetchScalarGridSpec(
            num_scalar_prefetch=0,
            grid=(N, n_s),
            in_specs=[pl.BlockSpec((1, C_r, TS), lambda n, s: (n, 0, s)),
                      pl.BlockSpec((C_r, 1), lambda n, s: (0, 0)),
                      pl.BlockSpec((C_r, 1), lambda n, s: (0, 0))],
            out_specs=pl.BlockSpec((1, C_r, TS), lambda n, s: (n, 0, s))),
        compiler_params=pltpu.CompilerParams(
            dimension_semantics=("parallel", "parallel")),
    )(y, scale, shift)

    # TODO(synk): Dropout(0.5) (use_dropout=True, training) and the decode
    # (ConvTranspose2d) branch are not implemented; this covers encode=True.
    return out[:, :C_out, :S].reshape(N, C_out, Ho, Wo)


# ---------------------------------------------------------------------------
# Pure-JAX reference (PyTorch semantics) for a correctness sanity-check
# ---------------------------------------------------------------------------
def block_reference(x, weight, gamma, beta, *, act="relu", eps=1e-5):
    xp = jnp.pad(x, ((0, 0), (0, 0), (1, 1), (1, 1)), mode="reflect")
    y = jax.lax.conv_general_dilated(
        xp, weight, window_strides=(2, 2), padding="VALID",
        dimension_numbers=("NCHW", "OIHW", "NCHW"),
        precision=jax.lax.Precision.HIGHEST)
    mean = jnp.mean(y, axis=(0, 2, 3), keepdims=True)
    var = jnp.mean((y - mean) ** 2, axis=(0, 2, 3), keepdims=True)
    z = gamma[None, :, None, None] * (y - mean) / jnp.sqrt(var + eps) \
        + beta[None, :, None, None]
    return jnp.maximum(z, 0.0) if act == "relu" else jnp.where(z >= 0.0, z, 0.2 * z)


if __name__ == "__main__":
    N, C_in, C_out, H, W = 2, 4, 8, 16, 16

    key = jax.random.PRNGKey(0)
    kx, kw = jax.random.split(key)
    x = jax.random.normal(kx, (N, C_in, H, W), dtype=jnp.float32)
    # deterministic synthetic Conv2d weight (C_out, C_in, 4, 4), bias=False
    weight = 0.1 * jax.random.normal(kw, (C_out, C_in, 4, 4), dtype=jnp.float32)
    # BatchNorm2d default affine params
    gamma = jnp.ones((C_out,), dtype=jnp.float32)
    beta = jnp.zeros((C_out,), dtype=jnp.float32)

    out = block_forward(x, weight, gamma, beta, act="relu")
    out = jax.block_until_ready(out)

    ref = block_reference(x, weight, gamma, beta, act="relu")
    assert out.shape == (N, C_out, H // 2, W // 2), out.shape
    # bf16 MXU operands + bf16 intermediate: tolerance reflects that (GAN block).
    assert jnp.allclose(out, ref, rtol=5e-2, atol=5e-2), \
        float(jnp.max(jnp.abs(out - ref)))

    print("KERNEL_OK")
</pallas_src>

<mosaic_0001>
module attributes {stable_mosaic.version = 11 : i64} {
  func.func @conv_stats_kernel(%arg0: i32, %arg1: i32, %arg2: i32, %arg3: memref<1x128x128xbf16, #tpu.memory_space<vmem>>, %arg4: memref<8x128xbf16, #tpu.memory_space<vmem>>, %arg5: memref<1x8x128xbf16, #tpu.memory_space<vmem>>, %arg6: memref<1x1x8x2xf32, #tpu.memory_space<vmem>>, %arg7: memref<8x128xf32, #tpu.memory_space<vmem>>) attributes {dimension_semantics = [#tpu.dimension_semantics<parallel>, #tpu.dimension_semantics<parallel>, #tpu.dimension_semantics<arbitrary>], iteration_bounds = array<i64: 2, 1, 1>, scalar_prefetch = 0 : i64, scratch_operands = 1 : i64, tpu.core_type = #tpu.core_type<tc>, window_params = [{transform_indices = @transform_0, window_bounds = array<i64: 1, 128, 128>}, {transform_indices = @transform_1, window_bounds = array<i64: 8, 128>}, {transform_indices = @transform_2, window_bounds = array<i64: 1, 8, 128>}, {transform_indices = @transform_3, window_bounds = array<i64: 1, 1, 8, 2>}]} {
    %c0_i32 = arith.constant 0 : i32
    %0 = arith.cmpi eq, %arg2, %c0_i32 : i32
    %1 = arith.extui %0 : i1 to i32
    %c0_i32_0 = arith.constant 0 : i32
    %2 = arith.cmpi ne, %1, %c0_i32_0 : i32
    scf.if %2 {
      %cst_11 = arith.constant 0.000000e+00 : f32
      %13 = vector.broadcast %cst_11 : f32 to vector<8x128xf32>
      %c0_12 = arith.constant 0 : index
      %c0_13 = arith.constant 0 : index
      %14 = vector.load %arg7[%c0_12, %c0_13] : memref<8x128xf32, #tpu.memory_space<vmem>>, vector<8x128xf32>
      tpu.vector_store %arg7[%c0_12, %c0_13], %13 {strides = array<i32>} : memref<8x128xf32, #tpu.memory_space<vmem>>, vector<8x128xf32>,
    } else {
    }
    %c0 = arith.constant 0 : index
    %c0_1 = arith.constant 0 : index
    %3 = vector.load %arg7[%c0, %c0_1] : memref<8x128xf32, #tpu.memory_space<vmem>>, vector<8x128xf32>
    %c0_2 = arith.constant 0 : index
    %c0_3 = arith.constant 0 : index
    %4 = vector.load %arg4[%c0_2, %c0_3] : memref<8x128xbf16, #tpu.memory_space<vmem>>, vector<8x128xbf16>
    %c0_4 = arith.constant 0 : index
    %c0_5 = arith.constant 0 : index
    %c0_6 = arith.constant 0 : index
    %5 = vector.load %arg3[%c0_4, %c0_5, %c0_6] : memref<1x128x128xbf16, #tpu.memory_space<vmem>>, vector<1x128x128xbf16>
    %6 = vector.shape_cast %5 : vector<1x128x128xbf16> to vector<128x128xbf16>
    %cst = arith.constant dense<0.000000e+00> : vector<8x128xf32>
    %7 = tpu.matmul %4, %6, %cst {dimension_numbers = #tpu.dot_dimension_numbers<[1], [0], [0], [1], [0, 0, 1, 1], [], []>} : vector<8x128xbf16>, vector<128x128xbf16>, vector<8x128xf32> -> vector<8x128xf32>
    %8 = arith.addf %3, %7 : vector<8x128xf32>
    %c0_7 = arith.constant 0 : index
    %c0_8 = arith.constant 0 : index
    %9 = vector.load %arg7[%c0_7, %c0_8] : memref<8x128xf32, #tpu.memory_space<vmem>>, vector<8x128xf32>
    tpu.vector_store %arg7[%c0_7, %c0_8], %8 {strides = array<i32>} : memref<8x128xf32, #tpu.memory_space<vmem>>, vector<8x128xf32>,
    %c0_i32_9 = arith.constant 0 : i32
    %10 = arith.cmpi eq, %arg2, %c0_i32_9 : i32
    %11 = arith.extui %10 : i1 to i32
    %c0_i32_10 = arith.constant 0 : i32
    %12 = arith.cmpi ne, %11, %c0_i32_10 : i32
    scf.if %12 {
      %c0_11 = arith.constant 0 : index
      %c0_12 = arith.constant 0 : index
      %13 = vector.load %arg7[%c0_11, %c0_12] : memref<8x128xf32, #tpu.memory_space<vmem>>, vector<8x128xf32>
      %14 = vector.shape_cast %13 : vector<8x128xf32> to vector<1x8x128xf32>
      %15 = arith.truncf %14 : vector<1x8x128xf32> to vector<1x8x128xbf16>
      %c0_13 = arith.constant 0 : index
      %c0_14 = arith.constant 0 : index
      %c0_15 = arith.constant 0 : index
      %16 = vector.load %arg5[%c0_13, %c0_14, %c0_15] : memref<1x8x128xbf16, #tpu.memory_space<vmem>>, vector<1x8x128xbf16>
      tpu.vector_store %arg5[%c0_13, %c0_14, %c0_15], %15 {strides = array<i32>} : memref<1x8x128xbf16, #tpu.memory_space<vmem>>, vector<1x8x128xbf16>,
      %cst_16 = arith.constant dense<0.000000e+00> : vector<8xf32>
      %17 = vector.multi_reduction <add>, %13, %cst_16 [1] : vector<8x128xf32> to vector<8xf32>
      %18 = vector.shape_cast %17 : vector<8xf32> to vector<8x1xf32>
      %19 = arith.mulf %13, %13 : vector<8x128xf32>
      %cst_17 = arith.constant dense<0.000000e+00> : vector<8xf32>
      %20 = vector.multi_reduction <add>, %19, %cst_17 [1] : vector<8x128xf32> to vector<8xf32>
      %21 = vector.shape_cast %20 : vector<8xf32> to vector<8x1xf32>
      %22 = tpu.concatenate %18, %21 in 1 : vector<8x1xf32>, vector<8x1xf32> -> vector<8x2xf32>
      %23 = vector.shape_cast %22 : vector<8x2xf32> to vector<1x1x8x2xf32>
      %c0_18 = arith.constant 0 : index
      %c0_19 = arith.constant 0 : index
      %c0_20 = arith.constant 0 : index
      %c0_21 = arith.constant 0 : index
      %24 = vector.load %arg6[%c0_18, %c0_19, %c0_20, %c0_21] : memref<1x1x8x2xf32, #tpu.memory_space<vmem>>, vector<1x1x8x2xf32>
      tpu.vector_store %arg6[%c0_18, %c0_19, %c0_20, %c0_21], %23 {strides = array<i32>} : memref<1x1x8x2xf32, #tpu.memory_space<vmem>>, vector<1x1x8x2xf32>,
    } else {
    }
    return
  }
  func.func @transform_0(%arg0: i32, %arg1: i32, %arg2: i32) -> (i32, i32, i32) {
    %c0_i32 = arith.constant 0 : i32
    return %arg0, %arg2, %arg1 : i32, i32, i32
  }
  func.func @transform_1(%arg0: i32, %arg1: i32, %arg2: i32) -> (i32, i32) {
    %c0_i32 = arith.constant 0 : i32
    %c0_i32_0 = arith.constant 0 : i32
    return %c0_i32, %arg2 : i32, i32
  }
  func.func @transform_2(%arg0: i32, %arg1: i32, %arg2: i32) -> (i32, i32, i32) {
    %c0_i32 = arith.constant 0 : i32
    %c0_i32_0 = arith.constant 0 : i32
    return %arg0, %c0_i32, %arg1 : i32, i32, i32
  }
  func.func @transform_3(%arg0: i32, %arg1: i32, %arg2: i32) -> (i32, i32, i32, i32) {
    %c0_i32 = arith.constant 0 : i32
    %c0_i32_0 = arith.constant 0 : i32
    %c0_i32_1 = arith.constant 0 : i32
    return %arg0, %arg1, %c0_i32, %c0_i32_0 : i32, i32, i32, i32
  }
}

</mosaic_0001>

<bundles_post_ra>
// kernel: tpu_custom_call.1
= control target key start
LH: loop header
LB: loop body
LE: loop exit
PB: predicated region body
PF: predicated region fallthrough
CT: control target
= control target key end

     0   :  { %9 = vsyncpa [#allocation4], 0  ;;  %s1072_s0 = inlined_call_operand.hbm [shape: bf16[2,128,128], index: 0, kind: input, shape index: {}]   ;;  %s1073_s1 = inlined_call_operand.hbm [shape: bf16[8,128], index: 1, kind: input, shape index: {}]   ;;  %s1074_s2 = inlined_call_operand.hbm [shape: bf16[2,8,128], index: 2, kind: output, shape index: {0}]   ;;  %s1075_s3 = inlined_call_operand.vmem [shape: f32[2,1,8,2], index: 3, kind: output, shape index: {1}]  }
   0x1   :  { %11 = vsyncpa [#allocation4 + $0x1], 0 }
   0x2   :  { %12 = vsyncpa [#allocation7], 0 }
   0x3   :  { %13 = vsyncpa [#allocation5], 0 }
   0x4   :  { %15 = vsyncpa [#allocation5 + $0x1], 0  ;;  %s853_s12 = smov 0   ;;  %s855_s13 = smov 0  }
   0x5   :  { %s857_s14 = smov 0   ;;  %s859_s15 = smov 0  }
   0x6   :  { %s861_s16 = smov 0   ;;  %s863_s17 = smov 0  }
   0x7 LB: > { %s540_s18 = sadd.s32 4294967295, %s824_s17   ;;  %s541_s19 = sadd.s32 4294967294, %s824_s17   ;;  %s824_s17 = sphi %s863_s17, %s21_s17   ;;  %s820_s16 = sphi %s861_s16, %s1103_s16   ;;  %s816_s15 = sphi %s859_s15, %s1102_s15   ;;  %s812_s14 = sphi %s857_s14, %s1101_s14   ;;  %s808_s13 = sphi %s855_s13, %s1100_s13   ;;  %s804_s12 = sphi %s853_s12, %s1099_s12  }
   0x8   : > { %s51_s20 = sadd.s32 1, %s812_s14  ;;  %p58_p0 = scmp.ne.s32.totalorder %s812_s14, %s808_s13 }
   0x9   : > { %p59_p1 = scmp.eq.s32.totalorder %s824_s17, 0  ;;  %p64_p2 = scmp.ne.s32.totalorder %s808_s13, %s804_s12 }
   0xa   : > { %p891_p3 = scmp.eq.s32.totalorder %s540_s18, 0  ;;  %p116_p4 = scmp.eq.s32.totalorder %s540_s18, 1 }
   0xb   : > { %p895_p5 = por %p59_p1, %p58_p0  ;;  %p122_p6 = scmp.eq.s32.totalorder %s541_s19, 1 }
   0xc   : > { %s1082_s21 = scalar_select %p891_p3, 1, 0 }
   0xd   : > { %p901_p7 = por %p891_p3, %p64_p2  ;;  %p905_p8 = por %p116_p4, %p58_p0 }
   0xe   : > { %p909_p9 = por %p122_p6, %p64_p2  ;;  %p542_p10 = scmp.ge.s32.totalorder %s824_s17, 1 }
   0xf   : > { %s1084_s23 = scalar_select %p901_p7, 1, 0 }
  0x10   : > { %s1085_s24 = scalar_select %p905_p8, 1, 0 }
  0x11   : > { %s1086_s25 = scalar_select %p909_p9, 1, 0 }
  0x12   : > { %p157_p11 = scmp.lt.s32.totalorder %s824_s17, 3  ;;  %s826_s27 = smov [#allocation6]  }
  0x13   : > { %s172_s28 = sshll.u32 %s826_s27, 4  ;;  %p616_p1 = scmp.lt.s32.totalorder %s824_s17, 2  ;;  %s173_s28 = int_to_ptr.vmem [resolvable:$true] %s172_s28 }
  0x14   : > { %p916_p13 = pnand %p542_p10, %p157_p11  ;;  %s40_s4 = sadd.s32 1, %s820_s16 }
  0x15   : > { %p925_p4 = pnand %p616_p1, %p895_p5  ;;  %p936_p6 = scmp.ge.s32.totalorder %s40_s4, 2 }
  0x16   : > { %s1087_s26 = scalar_select %p916_p13, 1, 0 }
  0x17   : > { %p603_p0 = pneg %p916_p13  ;;  %s183_s6 = sand.u32 1, %s812_s14  }
  0x18   : > { %s1088_s29 = scalar_select %p925_p4, 1, 0 }
  0x19   : > { %p931_p2 = pnand %p603_p0, %p891_p3  ;;  %s680_s9 = scalar_lea.hbm %s1073_s1, 64 }
  0x1a   : > { %s1090_s5 = scalar_select %p936_p6, 1, 0 }
  0x1b   : > { %p681_p5 = scmp.ne.s32.totalorder %s1073_s1, %s680_s9  ;;  %p682_p10 = pneg %p931_p2 }
  0x1c   : > { %p687_p0 = scmp.lt.u32.totalorder %s680_s9, %s1073_s1 }
  0x1d   : > { %p683_p11 = pnand %p682_p10, %p681_p5 }
  0x1f   : > { %p684_p1 = pneg %p683_p11 }
  0x21   : > { %p689_p12 = pnand %p687_p0, %p684_p1 }
  0x23   : > { %692 = shalt.err (!%p689_p12)
}
  0x24   : > { %s693_s22 = scalar_lea.vmem %s173_s28, 64  ;;  %p701_p7 = scmp.lt.s32.totalorder %s173_s28, %s173_s28 }
  0x25   : > { %p694_p9 = scmp.ne.s32.totalorder %s173_s28, %s693_s22  ;;  %p702_p13 = scmp.lt.s32.totalorder %s693_s22, %s693_s22 }
  0x27   : > { %p696_p8 = pnand %p694_p9, %p682_p10  ;;  %p703_p4 = por %p702_p13, %p701_p7 }
  0x29   : > { %p697_p3 = pneg %p696_p8 }
  0x2b   : > { %p704_p6 = pnand %p703_p4, %p697_p3 }
  0x2d   : > { %707 = shalt.err (!%p704_p6)
}
  0x2e   : > { %606 = dma.hbm_to_vmem [thread:$0]  (!%p931_p2), %s1073_s1, 64, %s173_s28, [#allocation7]  }
  0x2f   : > { %p1091_p9 = scmp.ne.s32.totalorder %s1090_s5, 0  ;;  %s545_s8 = sshll.u32 %s183_s6, 6 }
  0x30   : > { %s565_s10 = sshll.u32 %s820_s16, 10  ;;  %s187_s19 = scalar_lea.vmem [#allocation3], %s545_s8 }
  0x31   : > { %s1105_s4 = smov (%p1091_p9, %s40_s4), 0  ;;  %s967_s18 = scalar_lea.hbm %s1072_s0, %s565_s10 }
  0x32   : > { %s44_s9 = ssub.s32 %s820_s16, %s1105_s4  ;;  %s197_s22 = sshll.u32 %s187_s19, 4  ;;  %s974_s22 = int_to_ptr.vmem [resolvable:$true] %s197_s22 }
  0x33   : > { %p49_p3 = scmp.eq.s32.totalorder %s44_s9, 0  ;;  %s976_s5 = scalar_lea.sflag [#allocation4], %s183_s6 }
  0x34   : > { %s708_s27 = scalar_lea.hbm %s967_s18, 1024  ;;  %p1092_p8 = scmp.ne.s32.totalorder %s1088_s29, 0 }
  0x35   : > { %s972_s28 = scalar_select %p49_p3, %s812_s14, %s51_s20  }
  0x36   : > { %p709_p7 = scmp.ne.s32.totalorder %s967_s18, %s708_s27  ;;  %p710_p12 = pneg %p1092_p8 }
  0x37   : > { %s713_s8 = scalar_lea.hbm %s1072_s0, 2048  ;;  %p714_p2 = scmp.lt.u32.totalorder %s967_s18, %s1072_s0 }
  0x38   : > { %p711_p13 = pnand %p710_p12, %p709_p7  ;;  %p715_p6 = scmp.lt.u32.totalorder %s713_s8, %s708_s27 }
  0x39   : > { %p717_p10 = scmp.lt.u32.totalorder %s708_s27, %s967_s18 }
  0x3a   : > { %p712_p4 = pneg %p711_p13  ;;  %p716_p5 = por %p715_p6, %p714_p2 }
  0x3c   : > { %p718_p11 = por %p717_p10, %p716_p5 }
  0x3e   : > { %p719_p1 = pnand %p718_p11, %p712_p4 }
  0x40   : > { %722 = shalt.err (!%p719_p1)
}
  0x41   : > { %s723_s20 = scalar_lea.vmem %s974_s22, 1024  ;;  %s827_s6 = smov [#allocation3]  }
  0x42   : > { %p724_p0 = scmp.ne.s32.totalorder %s974_s22, %s723_s20  ;;  %s728_s11 = sshll.u32 %s827_s6, 4  ;;  %s729_s11 = int_to_ptr.vmem [resolvable:$false] %s728_s11 }
  0x43   : > { %s730_s19 = scalar_lea.vmem %s729_s11, 2048  ;;  %p731_p7 = scmp.lt.s32.totalorder %s974_s22, %s729_s11 }
  0x44   : > { %p726_p9 = pnand %p724_p0, %p710_p12  ;;  %p732_p13 = scmp.lt.s32.totalorder %s730_s19, %s723_s20 }
  0x46   : > { %p727_p3 = pneg %p726_p9  ;;  %p733_p2 = por %p732_p13, %p731_p7 }
  0x48   : > { %p734_p6 = pnand %p733_p2, %p727_p3 }
  0x4a   : > { %737 = shalt.err (!%p734_p6)
}
  0x4b   : > { %s828_s27 = smov 64   ;;  %s829_s7 = smov 4  }
  0x4c   : > { %610 = dma.hbm_to_vmem [thread:$0]  (!%p1092_p8), %s967_s18, 1024, %s974_s22, %s976_s5, %s828_s27, %s828_s27, %s829_s7  }
  0x4d   : > { %p1093_p12 = scmp.ne.s32.totalorder %s1087_s26, 0 }
  0x4e   : > { %s1007_s9 = sand.u32 (!%p1093_p12), 1, %s808_s13   ;;  %p1094_p4 = scmp.ne.s32.totalorder (!%p1093_p12), %s1084_s23, 0 }
  0x4f   : > { %209 = sbr.rel (%p1093_p12) target bundleno = 483 (0x1e3), region = 28  ;;  %s549_s8 = sshll.u32 (!%p1093_p12), %s1007_s9, 6 }
  0x50   : > { %s212_s10 = scalar_lea.sflag (!%p1093_p12), [#allocation4], %s1007_s9  ;;  %s215_s30 = scalar_lea.vmem (!%p1093_p12), [#allocation3], %s549_s8 }
  0x56   : > { %791 = dma.done.wait (%p1094_p4), %s212_s10, 1024  }
  0x57   : > { %793 = vsyncadd (%p1094_p4), %s212_s10, 4294966272  ;;  %p1095_p5 = scmp.ne.s32.totalorder %s1082_s21, 0 }
  0x59   : > { %795 = dma.done.wait (%p1095_p5), [#allocation7], 64  }
  0x5a   : > { %797 = vsyncadd (%p1095_p5), [#allocation7], 4294967232  ;;  %v830_v0 = vmov 0.0   ;;  %vm831_vm0 = vmmov 0   ;;  %v672_v1 = vld [vmem:[%s215_s30] sm:$0xff]   ;;  %v673_v2 = vld [vmem:[%s215_s30 + $0x8] sm:$0xff]  }
  0x5b   : > { %575 = vmatprep.subr.bf16.mxu0 %v830_v0  ;;  %591 = vmatprep.mubr.msk.bf16.mxu0 %vm831_vm0, %v830_v0  ;;  %v674_v3 = vld [vmem:[%s215_s30 + $0x10] sm:$0xff]   ;;  %v675_v4 = vld [vmem:[%s215_s30 + $0x18] sm:$0xff]   ;;  %v676_v5 = vld [vmem:[%s215_s30 + $0x20] sm:$0xff]   ;;  %s551_s21 = sshll.u32 %s1007_s9, 2  ;;  %s562_s26 = sshll.u32 %s816_s15, 6 }
  0x5c   : > { %576 = vmatpush3.bf16.msra.mxu0 %v672_v1  ;;  %v677_v6 = vld [vmem:[%s215_s30 + $0x28] sm:$0xff]   ;;  %v678_v7 = vld [vmem:[%s215_s30 + $0x30] sm:$0xff]   ;;  %v679_v8 = vld [vmem:[%s215_s30 + $0x38] sm:$0xff]   ;;  %s239_s23 = scalar_lea.vmem [#allocation8], %s551_s21  ;;  %s1024_s22 = scalar_lea.hbm %s1074_s2, %s562_s26 }
  0x5d   : > { %577 = vmatprep.subr.bf16.mxu0 %v830_v0  ;;  %v264_v9 = vld [vmem:[#allocation6] sm:$0xf]  ;;  %s408_s5 = sshll.u32 %s239_s23, 4  ;;  %s387_s20 = scalar_lea.sflag [#allocation5], %s1007_s9  ;;  %s409_s5 = int_to_ptr.vmem [resolvable:$true] %s408_s5 }
  0x5e   : > { %s738_s6 = scalar_lea.vmem %s409_s5, 64  ;;  %p1096_p10 = scmp.ne.s32.totalorder %s1085_s24, 0 }
  0x5f   : > { %p739_p8 = scmp.ne.s32.totalorder %s409_s5, %s738_s6  ;;  %s832_s11 = smov [#allocation8]  }
  0x60   : > { %578 = vmatpush3.bf16.msra.mxu0 %v673_v2  ;;  %s742_s19 = sshll.u32 %s832_s11, 4  ;;  %s743_s19 = int_to_ptr.vmem [resolvable:$false] %s742_s19 }
  0x61   : > { %579 = vmatprep.subr.bf16.mxu0 %v830_v0  ;;  %p740_p11 = pnand %p739_p8, %p1096_p10  ;;  %s744_s27 = scalar_lea.vmem %s743_s19, 128 }
  0x62   : > { %p745_p0 = scmp.lt.s32.totalorder %s409_s5, %s743_s19  ;;  %p746_p9 = scmp.lt.s32.totalorder %s744_s27, %s738_s6 }
  0x63   : > { %p741_p1 = pneg %p740_p11 }
  0x64   : > { %580 = vmatpush3.bf16.msra.mxu0 %v674_v3  ;;  %p747_p3 = por %p746_p9, %p745_p0 }
  0x65   : > { %581 = vmatprep.subr.bf16.mxu0 %v830_v0 }
  0x66   : > { %p748_p7 = pnand %p747_p3, %p741_p1 }
  0x68   : > { %582 = vmatpush3.bf16.msra.mxu0 %v675_v4 }
  0x69   : > { %583 = vmatprep.subr.bf16.mxu0 %v830_v0 }
  0x6c   : > { %584 = vmatpush3.bf16.msra.mxu0 %v676_v5 }
  0x6d   : > { %585 = vmatprep.subr.bf16.mxu0 %v830_v0 }
  0x70   : > { %586 = vmatpush3.bf16.msra.mxu0 %v677_v6 }
  0x71   : > { %587 = vmatprep.subr.bf16.mxu0 %v830_v0 }
  0x74   : > { %588 = vmatpush3.bf16.msra.mxu0 %v678_v7 }
  0x75   : > { %589 = vmatprep.subr.bf16.mxu0 %v830_v0 }
  0x78   : > { %590 = vmatpush3.bf16.msra.mxu0 %v679_v8 }
  0x7b   : > { %592 = vmatmul.mubr.bf16.vlgmr.msra.gmra.mrb[0].mxu0 %v264_v9 }
 0x14e   : > { %v363_v10 = vpop.f32.mrb[0].mxu0 }
 0x14f   : > { %v375_v11 = vpack.c.bf16 %v363_v10, %v363_v10  ;;  %377 = vadd.xlane.f32.xlu0 %v363_v10  ;;  %v593_v12 = vpop.f32.mrb[1].mxu0  ;;  %v379_v15 = vmul.f32 %v363_v10, %v363_v10 }
 0x150   : > { %v366_v13 = vpop.f32.mrb[2].mxu0 }
 0x151   : > { %v594_v14 = vpop.f32.mrb[3].mxu0  ;;  %376 = vst [vmem:[%s239_s23] sm:$0xf] %v375_v11 }
 0x153   : > { %380 = vadd.xlane.f32.xlu0 %v379_v15 }
 0x154   : > { %751 = shalt.err (!%p748_p7)
}
 0x155   : > { %s752_s7 = scalar_lea.hbm %s1024_s22, 64  ;;  %s756_s10 = scalar_lea.hbm %s1074_s2, 128 }
 0x156   : > { %p753_p13 = scmp.ne.s32.totalorder %s1024_s22, %s752_s7  ;;  %p757_p12 = scmp.lt.u32.totalorder %s1024_s22, %s1074_s2 }
 0x157   : > { %p758_p4 = scmp.lt.u32.totalorder %s756_s10, %s752_s7  ;;  %p760_p8 = scmp.lt.u32.totalorder %s752_s7, %s1024_s22 }
 0x158   : > { %p754_p2 = pnand %p753_p13, %p1096_p10 }
 0x159   : > { %p759_p5 = por %p758_p4, %p757_p12 }
 0x15a   : > { %p755_p6 = pneg %p754_p2 }
 0x15b   : > { %p761_p11 = por %p760_p8, %p759_p5 }
 0x15d   : > { %p762_p1 = pnand %p761_p11, %p755_p6 }
 0x15f   : > { %765 = shalt.err (!%p762_p1)
}
 0x160   : > { %601 = dma.vmem_to_hbm [thread:$0]  (%p1096_p10), %s409_s5, 64, %s1024_s22, %s387_s20   ;;  %vm382_vm1 = vcmask 7168   ;;  %vm384_vm2 = vcmask 15360  }
 0x161   : > { %p250_p0 = scmp.lt.s32.totalorder %s816_s15, 1 }
 0x163   : > { %s1107_s15 = smov (!%p250_p0, %s816_s15), 1 }
 0x164   : > { %s552_s23 = sshll.u32 %s1107_s15, 3 }
 0x165   : > { %s256_s18 = scalar_lea.vmem %s1075_s3, %s552_s23 }
 0x1dc   : > { %v378_v16 = vpop.xlane.xlu0 %377 }
 0x1e0   : > { %v381_v17 = vpop.xlane.xlu0 %380 }
 0x1e1   : > { %v383_v18 = vsel %vm382_vm1, %v378_v16, %v381_v17 }
 0x1e2   : > { %385 = vst.msk [vmem:[%s256_s18] sm:$0xff] %vm384_vm2, %v383_v18 }
 0x1e3 PF: > { %s423_s24 = sand.u32 1, %s804_s12   ;;  %p1097_p9 = scmp.ne.s32.totalorder %s1086_s25, 0 }
 0x1e4   : > { %p1098_p10 = scmp.ge.s32.totalorder %s824_s17, 2  ;;  %s424_s22 = scalar_lea.sflag [#allocation5], %s423_s24 }
 0x1e6   : > { %p612_p3 = pnand %p1098_p10, %p1097_p9 }
 0x1e8   : > { %799 = dma.done.wait (!%p612_p3), %s424_s22, 64  }
 0x1e9   : > { %801 = vsyncadd (!%p612_p3), %s424_s22, 4294967232  ;;  %s21_s17 = sadd.s32 1, %s824_s17   ;;  %s1099_s12 = smov %s808_s13 }
 0x1ea   : > { %p18_p7 = scmp.ge.s32.totalorder %s21_s17, 4   ;;  %s1100_s13 = smov %s812_s14 }
 0x1eb   : > { %s1101_s14 = smov %s972_s28  ;;  %s1102_s15 = smov %s820_s16 }
 0x1ec   : > { %s1103_s16 = smov %s1105_s4  ;;  %20 = sbr.rel (!%p18_p7) target bundleno = 7 (0x7), region = 98 }
 0x1f3   :  { %439 = vsyncpa [#allocation4], 1 }
 0x1f4   :  { %441 = vsyncpa [#allocation4 + $0x1], 1 }
 0x1f5   :  { %442 = vsyncpa [#allocation7], 1 }
 0x1f6   :  { %443 = vsyncpa [#allocation5], 1 }
 0x1f7   :  { %445 = vsyncpa [#allocation5 + $0x1], 1 }

</bundles_post_ra>
